<compile_context>
chip_gen: v6e
topology: v6e:2x2x1
jax: 0.10.0
libtpu: 0.0.40
codegen_flags: <defaults>
</compile_context>

<pallas_src>
import jax
import jax.numpy as jnp
from jax.experimental import pallas as pl
from jax.experimental.pallas import tpu as pltpu

LANE = 128      # lane width (last dim)
SUBLANE = 8     # sublane granularity (second-to-last dim)


def _round_up(n, m):
    return ((n + m - 1) // m) * m


def _cdiv(a, b):
    return (a + b - 1) // b


def _num_tensorcores():
    """TensorCores one kernel can shard a 'parallel' grid axis across."""
    try:
        kind = jax.devices()[0].device_kind.lower()
    except Exception:
        return 1
    if "v7" in kind:
        return 2          # dual TensorCore
    if "v4" in kind or "v5p" in kind:
        return 2          # megacore
    return 1              # v5e / v6e: single TensorCore


# ----------------------------------------------------------------------------
# Kernel
# ----------------------------------------------------------------------------
def _mlp_kernel(x_ref,
                w1_ref, b1_ref,
                w2_ref, b2_ref,
                w3_ref, b3_ref,
                w4_ref, b4_ref,
                w5_ref, b5_ref,
                o_ref):
    """Fused forward pass: 4x (Linear + ReLU) + final Linear.

    x_ref:  (TB, 360) f32 batch tile (cast to bf16 in-kernel, VPU has slack).
    w1_ref: (360, 128) bf16 (real in-dim, lane-padded out-dim), VMEM-resident.
    wK_ref: (128, 128) bf16, zero-padded, VMEM-resident (K >= 2).
    bK_ref: (1, 128) f32, zero-padded, VMEM-resident.
    o_ref:  (TB, 128) bf16 (lane-dense; true logits are columns [:2]).
    """
    h = x_ref[...].astype(jnp.bfloat16)

    def layer(h, w_ref, b_ref, relu):
        acc = jnp.dot(h, w_ref[...], preferred_element_type=jnp.float32)
        acc = acc + b_ref[...]
        if relu:
            # Padded lanes have zero weights + zero bias -> stay exactly zero,
            # so padding never leaks into real lanes.
            return jnp.maximum(acc, 0.0).astype(jnp.bfloat16)
        return acc

    h = layer(h, w1_ref, b1_ref, True)
    h = layer(h, w2_ref, b2_ref, True)
    h = layer(h, w3_ref, b3_ref, True)
    h = layer(h, w4_ref, b4_ref, True)
    o_ref[...] = layer(h, w5_ref, b5_ref, False).astype(o_ref.dtype)


# ----------------------------------------------------------------------------
# Parameter preparation (done once at load time)
# ----------------------------------------------------------------------------
def prepare_params(params):
    """Lane-pad output dims (and hidden input dims) to 128, cast W to bf16.

    params: list of (W_t, b) with W_t=(in, out) f32, b=(1, out) f32.
    The first layer keeps its real input dim (x is fed unpadded); every other
    layer's input dim is padded to match the previous layer's padded output.
    """
    prepared = []
    for idx, (w, b) in enumerate(params):
        fi, fo = w.shape
        fi_p = fi if idx == 0 else _round_up(fi, LANE)
        fo_p = _round_up(fo, LANE)
        w_p = jnp.zeros((fi_p, fo_p), jnp.float32).at[:fi, :fo].set(w)
        b_p = jnp.zeros((1, fo_p), jnp.float32).at[:, :fo].set(b)
        prepared.append((w_p.astype(jnp.bfloat16), b_p))
    return prepared


# ----------------------------------------------------------------------------
# Wrapper
# ----------------------------------------------------------------------------
def scan_classifier_forward(x, prepared_params, *, out_dim=2,
                            max_batch_tile=2048):
    """x: (B, input_size) f32.  prepared_params: output of prepare_params()."""
    B, in_dim = x.shape
    out_pad = prepared_params[-1][0].shape[1]
    num_tc = _num_tensorcores()

    # --- batch tiling -------------------------------------------------------
    b_pad = _round_up(max(B, SUBLANE), SUBLANE)
    n_steps = _cdiv(b_pad, max_batch_tile)
    if num_tc > 1 and b_pad >= num_tc * SUBLANE:
        # Balanced, even grid across the TensorCores.
        n_steps = _round_up(max(n_steps, num_tc), num_tc)
    tile = _round_up(_cdiv(b_pad, n_steps), SUBLANE)
    b_total = tile * n_steps          # waste <= ~SUBLANE per step, not a tile

    # Only pad the batch dim when needed (no feature padding, no f32->bf16
    # pre-pass: the cast happens in-kernel).
    if b_total != B:
        x_in = jnp.zeros((b_total, in_dim), x.dtype).at[:B].set(x)
    else:
        x_in = x

    flat_params = [arr for wb in prepared_params for arr in wb]
    # Weights/biases (~0.22 MiB) stay fully resident in VMEM for the whole
    # grid instead of per-step double-buffered DMAs.
    weight_specs = [pl.BlockSpec(memory_space=pltpu.MemorySpace.VMEM)
                    for _ in flat_params]

    macs_per_row = sum(int(w.shape[0]) * int(w.shape[1])
                       for w, _ in prepared_params)
    param_bytes = sum(w.size * 2 + b.size * 4 for w, b in prepared_params)
    cost = pl.CostEstimate(
        flops=2 * b_total * macs_per_row,
        transcendentals=0,
        bytes_accessed=b_total * (in_dim * 4 + out_pad * 2) + int(param_bytes),
    )

    out_padded = pl.pallas_call(
        _mlp_kernel,
        out_shape=jax.ShapeDtypeStruct((b_total, out_pad), jnp.bfloat16),
        grid_spec=pltpu.PrefetchScalarGridSpec(
            num_scalar_prefetch=0,
            grid=(n_steps,),
            in_specs=[pl.BlockSpec((tile, in_dim), lambda i: (i, 0))]
                     + weight_specs,
            out_specs=pl.BlockSpec((tile, out_pad), lambda i: (i, 0)),
        ),
        compiler_params=pltpu.CompilerParams(
            dimension_semantics=("parallel",)),
        cost_estimate=cost,
    )(x_in, *flat_params)

    # Only the tiny (B, 2) logits slab leaves bf16.
    return out_padded[:B, :out_dim].astype(jnp.float32)


# ----------------------------------------------------------------------------
# Init + references
# ----------------------------------------------------------------------------
def init_params(key, input_size=360):
    """PyTorch Linear default init: U(-1/sqrt(fan_in), +1/sqrt(fan_in)).

    Weights returned already transposed to (in, out); biases as (1, out); f32.
    """
    dims = [input_size, 72, 58, 39, 22, 2]
    params = []
    for i in range(len(dims) - 1):
        fan_in, fan_out = dims[i], dims[i + 1]
        key, kw, kb = jax.random.split(key, 3)
        bound = 1.0 / jnp.sqrt(jnp.float32(fan_in))
        w_t = jax.random.uniform(kw, (fan_in, fan_out), jnp.float32, -bound, bound)
        b = jax.random.uniform(kb, (1, fan_out), jnp.float32, -bound, bound)
        params.append((w_t, b))
    return params


def reference_forward_f32(x, params):
    h = x
    for i, (w, b) in enumerate(params):
        h = h @ w + b
        if i < len(params) - 1:
            h = jnp.maximum(h, 0.0)
    return h


def reference_forward_bf16(x, params):
    """Mirrors the kernel's bf16-input / f32-accumulation numerics."""
    h = x.astype(jnp.bfloat16)
    n = len(params)
    out = None
    for i, (w, b) in enumerate(params):
        acc = jnp.dot(h, w.astype(jnp.bfloat16),
                      preferred_element_type=jnp.float32) + b
        if i < n - 1:
            h = jnp.maximum(acc, 0.0).astype(jnp.bfloat16)
        else:
            out = acc
    return out


if __name__ == "__main__":
    key = jax.random.PRNGKey(0)
    k_x, k_x2, k_p = jax.random.split(key, 3)

    input_size = 360
    params = init_params(k_p, input_size=input_size)
    prepared = prepare_params(params)  # pad + bf16-cast once at load time

    # --- small aligned batch (no padding path) ---
    batch = 8
    x = jax.random.normal(k_x, (batch, input_size), jnp.float32)
    out = jax.block_until_ready(scan_classifier_forward(x, prepared))
    assert out.shape == (batch, 2), out.shape

    ref_bf16 = reference_forward_bf16(x, params)
    assert jnp.allclose(out, ref_bf16, atol=1e-2, rtol=1e-2), \
        "mismatch vs bf16-matched JAX reference"
    ref_f32 = reference_forward_f32(x, params)
    assert jnp.allclose(out, ref_f32, atol=1e-1), "mismatch vs f32 reference"

    # --- ragged batch (exercises batch padding + multi-step/balanced grid) ---
    batch2 = 20
    x2 = jax.random.normal(k_x2, (batch2, input_size), jnp.float32)
    out2 = jax.block_until_ready(scan_classifier_forward(x2, prepared))
    assert out2.shape == (batch2, 2), out2.shape
    ref2 = reference_forward_bf16(x2, params)
    assert jnp.allclose(out2, ref2, atol=1e-2, rtol=1e-2), \
        "ragged-batch mismatch vs bf16-matched JAX reference"

    print("KERNEL_OK")
</pallas_src>

<mosaic_0001>
module attributes {stable_mosaic.version = 11 : i64} {
  func.func @_mlp_kernel(%arg0: i32, %arg1: memref<8x360xf32, #tpu.memory_space<vmem>>, %arg2: memref<360x128xbf16, #tpu.memory_space<vmem>>, %arg3: memref<1x128xf32, #tpu.memory_space<vmem>>, %arg4: memref<128x128xbf16, #tpu.memory_space<vmem>>, %arg5: memref<1x128xf32, #tpu.memory_space<vmem>>, %arg6: memref<128x128xbf16, #tpu.memory_space<vmem>>, %arg7: memref<1x128xf32, #tpu.memory_space<vmem>>, %arg8: memref<128x128xbf16, #tpu.memory_space<vmem>>, %arg9: memref<1x128xf32, #tpu.memory_space<vmem>>, %arg10: memref<128x128xbf16, #tpu.memory_space<vmem>>, %arg11: memref<1x128xf32, #tpu.memory_space<vmem>>, %arg12: memref<8x128xbf16, #tpu.memory_space<vmem>>) attributes {dimension_semantics = [#tpu.dimension_semantics<parallel>], iteration_bounds = array<i64: 1>, scalar_prefetch = 0 : i64, scratch_operands = 0 : i64, tpu.core_type = #tpu.core_type<tc>, window_params = [{transform_indices = @transform_0, window_bounds = array<i64: 8, 360>}, {pipeline_mode = #tpu.pipeline_mode<synchronous>, transform_indices = @transform_1, window_bounds = array<i64: 360, 128>}, {pipeline_mode = #tpu.pipeline_mode<synchronous>, transform_indices = @transform_2, window_bounds = array<i64: 1, 128>}, {pipeline_mode = #tpu.pipeline_mode<synchronous>, transform_indices = @transform_3, window_bounds = array<i64: 128, 128>}, {pipeline_mode = #tpu.pipeline_mode<synchronous>, transform_indices = @transform_4, window_bounds = array<i64: 1, 128>}, {pipeline_mode = #tpu.pipeline_mode<synchronous>, transform_indices = @transform_5, window_bounds = array<i64: 128, 128>}, {pipeline_mode = #tpu.pipeline_mode<synchronous>, transform_indices = @transform_6, window_bounds = array<i64: 1, 128>}, {pipeline_mode = #tpu.pipeline_mode<synchronous>, transform_indices = @transform_7, window_bounds = array<i64: 128, 128>}, {pipeline_mode = #tpu.pipeline_mode<synchronous>, transform_indices = @transform_8, window_bounds = array<i64: 1, 128>}, {pipeline_mode = #tpu.pipeline_mode<synchronous>, transform_indices = @transform_9, window_bounds = array<i64: 128, 128>}, {pipeline_mode = #tpu.pipeline_mode<synchronous>, transform_indices = @transform_10, window_bounds = array<i64: 1, 128>}, {transform_indices = @transform_11, window_bounds = array<i64: 8, 128>}]} {
    %c0 = arith.constant 0 : index
    %c0_0 = arith.constant 0 : index
    %0 = vector.load %arg1[%c0, %c0_0] : memref<8x360xf32, #tpu.memory_space<vmem>>, vector<8x360xf32>
    %1 = arith.truncf %0 : vector<8x360xf32> to vector<8x360xbf16>
    %c0_1 = arith.constant 0 : index
    %c0_2 = arith.constant 0 : index
    %2 = vector.load %arg2[%c0_1, %c0_2] : memref<360x128xbf16, #tpu.memory_space<vmem>>, vector<360x128xbf16>
    %cst = arith.constant dense<0.000000e+00> : vector<8x128xf32>
    %3 = tpu.matmul %1, %2, %cst {dimension_numbers = #tpu.dot_dimension_numbers<[1], [0], [0], [1], [0, 0, 1, 1], [], []>} : vector<8x360xbf16>, vector<360x128xbf16>, vector<8x128xf32> -> vector<8x128xf32>
    %c0_3 = arith.constant 0 : index
    %c0_4 = arith.constant 0 : index
    %4 = vector.load %arg3[%c0_3, %c0_4] : memref<1x128xf32, #tpu.memory_space<vmem>>, vector<1x128xf32>
    %5 = vector.broadcast %4 : vector<1x128xf32> to vector<8x128xf32>
    %6 = arith.addf %3, %5 : vector<8x128xf32>
    %cst_5 = arith.constant 0.000000e+00 : f32
    %7 = vector.broadcast %cst_5 : f32 to vector<8x128xf32>
    %8 = arith.maximumf %6, %7 : vector<8x128xf32>
    %9 = arith.truncf %8 : vector<8x128xf32> to vector<8x128xbf16>
    %c0_6 = arith.constant 0 : index
    %c0_7 = arith.constant 0 : index
    %10 = vector.load %arg4[%c0_6, %c0_7] : memref<128x128xbf16, #tpu.memory_space<vmem>>, vector<128x128xbf16>
    %cst_8 = arith.constant dense<0.000000e+00> : vector<8x128xf32>
    %11 = tpu.matmul %9, %10, %cst_8 {dimension_numbers = #tpu.dot_dimension_numbers<[1], [0], [0], [1], [0, 0, 1, 1], [], []>} : vector<8x128xbf16>, vector<128x128xbf16>, vector<8x128xf32> -> vector<8x128xf32>
    %c0_9 = arith.constant 0 : index
    %c0_10 = arith.constant 0 : index
    %12 = vector.load %arg5[%c0_9, %c0_10] : memref<1x128xf32, #tpu.memory_space<vmem>>, vector<1x128xf32>
    %13 = vector.broadcast %12 : vector<1x128xf32> to vector<8x128xf32>
    %14 = arith.addf %11, %13 : vector<8x128xf32>
    %cst_11 = arith.constant 0.000000e+00 : f32
    %15 = vector.broadcast %cst_11 : f32 to vector<8x128xf32>
    %16 = arith.maximumf %14, %15 : vector<8x128xf32>
    %17 = arith.truncf %16 : vector<8x128xf32> to vector<8x128xbf16>
    %c0_12 = arith.constant 0 : index
    %c0_13 = arith.constant 0 : index
    %18 = vector.load %arg6[%c0_12, %c0_13] : memref<128x128xbf16, #tpu.memory_space<vmem>>, vector<128x128xbf16>
    %cst_14 = arith.constant dense<0.000000e+00> : vector<8x128xf32>
    %19 = tpu.matmul %17, %18, %cst_14 {dimension_numbers = #tpu.dot_dimension_numbers<[1], [0], [0], [1], [0, 0, 1, 1], [], []>} : vector<8x128xbf16>, vector<128x128xbf16>, vector<8x128xf32> -> vector<8x128xf32>
    %c0_15 = arith.constant 0 : index
    %c0_16 = arith.constant 0 : index
    %20 = vector.load %arg7[%c0_15, %c0_16] : memref<1x128xf32, #tpu.memory_space<vmem>>, vector<1x128xf32>
    %21 = vector.broadcast %20 : vector<1x128xf32> to vector<8x128xf32>
    %22 = arith.addf %19, %21 : vector<8x128xf32>
    %cst_17 = arith.constant 0.000000e+00 : f32
    %23 = vector.broadcast %cst_17 : f32 to vector<8x128xf32>
    %24 = arith.maximumf %22, %23 : vector<8x128xf32>
    %25 = arith.truncf %24 : vector<8x128xf32> to vector<8x128xbf16>
    %c0_18 = arith.constant 0 : index
    %c0_19 = arith.constant 0 : index
    %26 = vector.load %arg8[%c0_18, %c0_19] : memref<128x128xbf16, #tpu.memory_space<vmem>>, vector<128x128xbf16>
    %cst_20 = arith.constant dense<0.000000e+00> : vector<8x128xf32>
    %27 = tpu.matmul %25, %26, %cst_20 {dimension_numbers = #tpu.dot_dimension_numbers<[1], [0], [0], [1], [0, 0, 1, 1], [], []>} : vector<8x128xbf16>, vector<128x128xbf16>, vector<8x128xf32> -> vector<8x128xf32>
    %c0_21 = arith.constant 0 : index
    %c0_22 = arith.constant 0 : index
    %28 = vector.load %arg9[%c0_21, %c0_22] : memref<1x128xf32, #tpu.memory_space<vmem>>, vector<1x128xf32>
    %29 = vector.broadcast %28 : vector<1x128xf32> to vector<8x128xf32>
    %30 = arith.addf %27, %29 : vector<8x128xf32>
    %cst_23 = arith.constant 0.000000e+00 : f32
    %31 = vector.broadcast %cst_23 : f32 to vector<8x128xf32>
    %32 = arith.maximumf %30, %31 : vector<8x128xf32>
    %33 = arith.truncf %32 : vector<8x128xf32> to vector<8x128xbf16>
    %c0_24 = arith.constant 0 : index
    %c0_25 = arith.constant 0 : index
    %34 = vector.load %arg10[%c0_24, %c0_25] : memref<128x128xbf16, #tpu.memory_space<vmem>>, vector<128x128xbf16>
    %cst_26 = arith.constant dense<0.000000e+00> : vector<8x128xf32>
    %35 = tpu.matmul %33, %34, %cst_26 {dimension_numbers = #tpu.dot_dimension_numbers<[1], [0], [0], [1], [0, 0, 1, 1], [], []>} : vector<8x128xbf16>, vector<128x128xbf16>, vector<8x128xf32> -> vector<8x128xf32>
    %c0_27 = arith.constant 0 : index
    %c0_28 = arith.constant 0 : index
    %36 = vector.load %arg11[%c0_27, %c0_28] : memref<1x128xf32, #tpu.memory_space<vmem>>, vector<1x128xf32>
    %37 = vector.broadcast %36 : vector<1x128xf32> to vector<8x128xf32>
    %38 = arith.addf %35, %37 : vector<8x128xf32>
    %39 = arith.truncf %38 : vector<8x128xf32> to vector<8x128xbf16>
    %c0_29 = arith.constant 0 : index
    %c0_30 = arith.constant 0 : index
    %40 = vector.load %arg12[%c0_29, %c0_30] : memref<8x128xbf16, #tpu.memory_space<vmem>>, vector<8x128xbf16>
    tpu.vector_store %arg12[%c0_29, %c0_30], %39 {strides = array<i32>} : memref<8x128xbf16, #tpu.memory_space<vmem>>, vector<8x128xbf16>,
    return
  }
  func.func @transform_0(%arg0: i32) -> (i32, i32) {
    %c0_i32 = arith.constant 0 : i32
    %c0_i32_0 = arith.constant 0 : i32
    return %arg0, %c0_i32 : i32, i32
  }
  func.func @transform_1(%arg0: i32) -> (i32, i32) {
    %c0_i32 = arith.constant 0 : i32
    %c0_i32_0 = arith.constant 0 : i32
    %c0_i32_1 = arith.constant 0 : i32
    return %c0_i32, %c0_i32_0 : i32, i32
  }
  func.func @transform_2(%arg0: i32) -> (i32, i32) {
    %c0_i32 = arith.constant 0 : i32
    %c0_i32_0 = arith.constant 0 : i32
    %c0_i32_1 = arith.constant 0 : i32
    return %c0_i32, %c0_i32_0 : i32, i32
  }
  func.func @transform_3(%arg0: i32) -> (i32, i32) {
    %c0_i32 = arith.constant 0 : i32
    %c0_i32_0 = arith.constant 0 : i32
    %c0_i32_1 = arith.constant 0 : i32
    return %c0_i32, %c0_i32_0 : i32, i32
  }
  func.func @transform_4(%arg0: i32) -> (i32, i32) {
    %c0_i32 = arith.constant 0 : i32
    %c0_i32_0 = arith.constant 0 : i32
    %c0_i32_1 = arith.constant 0 : i32
    return %c0_i32, %c0_i32_0 : i32, i32
  }
  func.func @transform_5(%arg0: i32) -> (i32, i32) {
    %c0_i32 = arith.constant 0 : i32
    %c0_i32_0 = arith.constant 0 : i32
    %c0_i32_1 = arith.constant 0 : i32
    return %c0_i32, %c0_i32_0 : i32, i32
  }
  func.func @transform_6(%arg0: i32) -> (i32, i32) {
    %c0_i32 = arith.constant 0 : i32
    %c0_i32_0 = arith.constant 0 : i32
    %c0_i32_1 = arith.constant 0 : i32
    return %c0_i32, %c0_i32_0 : i32, i32
  }
  func.func @transform_7(%arg0: i32) -> (i32, i32) {
    %c0_i32 = arith.constant 0 : i32
    %c0_i32_0 = arith.constant 0 : i32
    %c0_i32_1 = arith.constant 0 : i32
    return %c0_i32, %c0_i32_0 : i32, i32
  }
  func.func @transform_8(%arg0: i32) -> (i32, i32) {
    %c0_i32 = arith.constant 0 : i32
    %c0_i32_0 = arith.constant 0 : i32
    %c0_i32_1 = arith.constant 0 : i32
    return %c0_i32, %c0_i32_0 : i32, i32
  }
  func.func @transform_9(%arg0: i32) -> (i32, i32) {
    %c0_i32 = arith.constant 0 : i32
    %c0_i32_0 = arith.constant 0 : i32
    %c0_i32_1 = arith.constant 0 : i32
    return %c0_i32, %c0_i32_0 : i32, i32
  }
  func.func @transform_10(%arg0: i32) -> (i32, i32) {
    %c0_i32 = arith.constant 0 : i32
    %c0_i32_0 = arith.constant 0 : i32
    %c0_i32_1 = arith.constant 0 : i32
    return %c0_i32, %c0_i32_0 : i32, i32
  }
  func.func @transform_11(%arg0: i32) -> (i32, i32) {
    %c0_i32 = arith.constant 0 : i32
    %c0_i32_0 = arith.constant 0 : i32
    return %arg0, %c0_i32 : i32, i32
  }
}

</mosaic_0001>

<bundles_post_ra>
// kernel: tpu_custom_call.1
= control target key start
LH: loop header
LB: loop body
LE: loop exit
PB: predicated region body
PF: predicated region fallthrough
CT: control target
= control target key end

     0   :  { %16 = vsyncpa [#allocation3], 0  ;;  %s1485_s0 = inlined_call_operand.hbm [shape: f32[8,360], index: 0, kind: input, shape index: {}]   ;;  %s1486_s1 = inlined_call_operand.hbm [shape: bf16[360,128], index: 1, kind: input, shape index: {}]   ;;  %s1487_s2 = inlined_call_operand.vmem [shape: f32[1,128], index: 2, kind: input, shape index: {}]   ;;  %s1488_s3 = inlined_call_operand.hbm [shape: bf16[128,128], index: 3, kind: input, shape index: {}]   ;;  %s1489_s4 = inlined_call_operand.vmem [shape: f32[1,128], index: 4, kind: input, shape index: {}]   ;;  %s1490_s5 = inlined_call_operand.hbm [shape: bf16[128,128], index: 5, kind: input, shape index: {}]   ;;  %s1491_s6 = inlined_call_operand.vmem [shape: f32[1,128], index: 6, kind: input, shape index: {}]   ;;  %s1492_s7 = inlined_call_operand.hbm [shape: bf16[128,128], index: 7, kind: input, shape index: {}]   ;;  %s1493_s8 = inlined_call_operand.vmem [shape: f32[1,128], index: 8, kind: input, shape index: {}]   ;;  %s1494_s9 = inlined_call_operand.hbm [shape: bf16[128,128], index: 9, kind: input, shape index: {}]   ;;  %s1495_s10 = inlined_call_operand.vmem [shape: f32[1,128], index: 10, kind: input, shape index: {}]   ;;  %s1496_s11 = inlined_call_operand.hbm [shape: bf16[8,128], index: 11, kind: output, shape index: {}]  }
   0x1   :  { %17 = vsyncpa [#allocation6], 0 }
   0x2   :  { %18 = vsyncpa [#allocation9], 0 }
   0x3   :  { %19 = vsyncpa [#allocation12], 0 }
   0x4   :  { %20 = vsyncpa [#allocation4], 0  ;;  %s1314_s17 = smov [#allocation5]  }
   0x5   :  { %s36_s18 = sshll.u32 %s1314_s17, 4  ;;  %s37_s18 = int_to_ptr.vmem [resolvable:$true] %s36_s18 }
   0x6   :  { %s1172_s19 = scalar_lea.vmem %s37_s18, 2880  ;;  %p1177_p1 = scmp.lt.s32.totalorder %s37_s18, %s37_s18 }
   0x7   :  { %p1173_p0 = scmp.ne.s32.totalorder %s37_s18, %s1172_s19  ;;  %p1178_p2 = scmp.lt.s32.totalorder %s1172_s19, %s1172_s19 }
   0x9   :  { %p1179_p3 = por %p1178_p2, %p1177_p1 }
   0xb   :  { %p1180_p4 = pnand %p1179_p3, %p1173_p0 }
   0xd   :  { %1183 = shalt.err (!%p1180_p4)
}
   0xe   :  { %s1315_s20 = smov 64   ;;  %s1316_s21 = smov 4  }
   0xf   :  { %42 = dma.hbm_to_vmem [thread:$0]  %s1486_s1, 2880, %s37_s18, [#allocation6], %s1315_s20, %s1315_s20, %s1316_s21  }
  0x10   :  { %s1317_s24 = smov [#allocation8]   ;;  %s1318_s26 = smov [#allocation2]  }
  0x11   :  { %s64_s25 = sshll.u32 %s1317_s24, 4  ;;  %s27_s27 = sshll.u32 %s1318_s26, 4  ;;  %s65_s25 = int_to_ptr.vmem [resolvable:$true] %s64_s25  ;;  %s28_s27 = int_to_ptr.vmem [resolvable:$true] %s27_s27 }
  0x12   :  { %s1192_s28 = scalar_lea.vmem %s65_s25, 1024  ;;  %p1197_p6 = scmp.lt.s32.totalorder %s65_s25, %s65_s25 }
  0x13   :  { %p1193_p5 = scmp.ne.s32.totalorder %s65_s25, %s1192_s28  ;;  %p1198_p7 = scmp.lt.s32.totalorder %s1192_s28, %s1192_s28 }
  0x15   :  { %p1199_p8 = por %p1198_p7, %p1197_p6 }
  0x17   :  { %p1200_p9 = pnand %p1199_p8, %p1193_p5 }
  0x19   :  { %1203 = shalt.err (!%p1200_p9)
}
  0x1a   :  { %70 = dma.hbm_to_vmem [thread:$0]  %s1490_s5, 1024, %s65_s25, [#allocation9], %s1315_s20, %s1315_s20, %s1316_s21  }
  0x1b   :  { %s1212_s1 = scalar_lea.vmem %s28_s27, 384  ;;  %p1217_p11 = scmp.lt.s32.totalorder %s28_s27, %s28_s27 }
  0x1c   :  { %p1213_p10 = scmp.ne.s32.totalorder %s28_s27, %s1212_s1  ;;  %p1218_p12 = scmp.lt.s32.totalorder %s1212_s1, %s1212_s1 }
  0x1e   :  { %p1219_p13 = por %p1218_p12, %p1217_p11 }
  0x20   :  { %p1220_p0 = pnand %p1219_p13, %p1213_p10 }
  0x22   :  { %1223 = shalt.err (!%p1220_p0)
}
  0x23   :  { %30 = dma.hbm_to_vmem [thread:$0]  %s1485_s0, 384, %s28_s27, [#allocation3]  }
  0x24   :  { %s1319_s14 = smov [#allocation7]   ;;  %s1320_s16 = smov [#allocation10]  }
  0x25   :  { %s50_s15 = sshll.u32 %s1319_s14, 4  ;;  %s78_s17 = sshll.u32 %s1320_s16, 4  ;;  %s51_s15 = int_to_ptr.vmem [resolvable:$true] %s50_s15  ;;  %s79_s17 = int_to_ptr.vmem [resolvable:$true] %s78_s17 }
  0x26   :  { %s1232_s18 = scalar_lea.vmem %s51_s15, 1024  ;;  %p1237_p2 = scmp.lt.s32.totalorder %s51_s15, %s51_s15 }
  0x27   :  { %p1233_p1 = scmp.ne.s32.totalorder %s51_s15, %s1232_s18  ;;  %p1238_p3 = scmp.lt.s32.totalorder %s1232_s18, %s1232_s18 }
  0x29   :  { %p1239_p4 = por %p1238_p3, %p1237_p2 }
  0x2b   :  { %p1240_p5 = pnand %p1239_p4, %p1233_p1 }
  0x2d   :  { %1243 = shalt.err (!%p1240_p5)
}
  0x2e   :  { %56 = dma.hbm_to_vmem [thread:$0]  %s1488_s3, 1024, %s51_s15, [#allocation6], %s1315_s20, %s1315_s20, %s1316_s21  }
  0x2f   :  { %s1252_s0 = scalar_lea.vmem %s79_s17, 1024  ;;  %p1257_p7 = scmp.lt.s32.totalorder %s79_s17, %s79_s17 }
  0x30   :  { %p1253_p6 = scmp.ne.s32.totalorder %s79_s17, %s1252_s0  ;;  %p1258_p8 = scmp.lt.s32.totalorder %s1252_s0, %s1252_s0 }
  0x32   :  { %p1259_p9 = por %p1258_p8, %p1257_p7 }
  0x34   :  { %p1260_p10 = pnand %p1259_p9, %p1253_p6 }
  0x36   :  { %1263 = shalt.err (!%p1260_p10)
}
  0x37   :  { %84 = dma.hbm_to_vmem [thread:$0]  %s1492_s7, 1024, %s79_s17, [#allocation9], %s1315_s20, %s1315_s20, %s1316_s21  }
  0x38   :  { %s1321_s24 = smov [#allocation11]  }
  0x39   :  { %s92_s25 = sshll.u32 %s1321_s24, 4  ;;  %s93_s25 = int_to_ptr.vmem [resolvable:$true] %s92_s25 }
  0x3a   :  { %s1272_s26 = scalar_lea.vmem %s93_s25, 1024  ;;  %p1277_p12 = scmp.lt.s32.totalorder %s93_s25, %s93_s25 }
  0x3b   :  { %p1273_p11 = scmp.ne.s32.totalorder %s93_s25, %s1272_s26  ;;  %p1278_p13 = scmp.lt.s32.totalorder %s1272_s26, %s1272_s26 }
  0x3d   :  { %p1279_p0 = por %p1278_p13, %p1277_p12 }
  0x3f   :  { %p1280_p1 = pnand %p1279_p0, %p1273_p11 }
  0x41   :  { %1283 = shalt.err (!%p1280_p1)
}
  0x42   :  { %98 = dma.hbm_to_vmem [thread:$0]  %s1494_s9, 1024, %s93_s25, [#allocation12], %s1315_s20, %s1315_s20, %s1316_s21  }
  0x43   :  { %1304 = dma.done.wait [#allocation3], 384  }
  0x44   :  { %1305 = vsyncadd [#allocation3], 4294966912 }
  0x45   :  { %1306 = dma.done.wait [#allocation6], 3904  }
  0x46   :  { %1307 = vsyncadd [#allocation6], 4294963392 }
  0x47   :  { %1308 = dma.done.wait [#allocation9], 2048  }
  0x48   :  { %1309 = vsyncadd [#allocation9], 4294965248 }
  0x49   :  { %1310 = dma.done.wait [#allocation12], 1024  }
  0x4a   :  { %1311 = vsyncadd [#allocation12], 4294966272  ;;  %v1322_v0 = vmov 0.0   ;;  %vm1323_vm0 = vmmov 0   ;;  %v1109_v1 = vld [vmem:[#allocation5 + $0x78] sm:$0xff]   ;;  %v1111_v3 = vld [vmem:[#allocation5 + $0x70] sm:$0xff]  }
  0x4b   :  { %1000 = vmatprep.subr.bf16.mxu1 %v1322_v0  ;;  %1014 = vmatprep.mubr.msk.bf16.mxu1 %vm1323_vm0, %v1322_v0  ;;  %v1110_v2 = vld [vmem:[#allocation5 + $0x38] sm:$0xff]   ;;  %v1112_v4 = vld [vmem:[#allocation5 + $0x30] sm:$0xff]   ;;  %vm317_vm1 = vcmask 1043456   ;;  %v1114_v6 = vld [vmem:[#allocation5 + $0x68] sm:$0xff]   ;;  %vm313_vm2 = vcmask 850944   ;;  %s1324_s1 = smov [#allocation13]  }
  0x4c   :  { %934 = vmatprep.subr.bf16.mxu0 %v1109_v1  ;;  %v1113_v5 = vld [vmem:[#allocation5 + $0xb0] ss:$0 sps:$4 sm:$0xff]   ;;  %v1115_v8 = vld [vmem:[#allocation5 + $0x28] sm:$0xff]   ;;  %v1117_v10 = vld [vmem:[#allocation5 + $0x60] sm:$0xff]   ;;  %s861_s12 = sshll.u32 %s1324_s1, 4  ;;  %s862_s12 = int_to_ptr.vmem [resolvable:$true] %s861_s12 }
  0x4d   :  { %935 = vmatpush3.bf16.msra.mxu0 %v1110_v2  ;;  %v319_v7 = vsel %vm317_vm1, %v1113_v5, 0  ;;  %v1116_v9 = vld [vmem:[#allocation5 + $0xa8] sm:$0xff]   ;;  %v1118_v11 = vld [vmem:[#allocation5 + $0x20] sm:$0xff]   ;;  %v1120_v13 = vld [vmem:[#allocation5 + $0x58] sm:$0xff]   ;;  %p1289_p3 = scmp.lt.s32.totalorder %s862_s12, %s862_s12 }
  0x4e   :  { %936 = vmatprep.subr.bf16.mxu0 %v1111_v3  ;;  %1001 = vmatpush3.bf16.msra.mxu1 %v319_v7  ;;  %v1119_v12 = vld [vmem:[#allocation5 + $0xa0] sm:$0xff]   ;;  %v1121_v14 = vld [vmem:[#allocation5 + $0x18] sm:$0xff]   ;;  %v1123_v16 = vld [vmem:[#allocation5 + $0x50] sm:$0xff]  }
  0x4f   :  { %1002 = vmatprep.subr.bf16.mxu1 %v1322_v0  ;;  %v1122_v15 = vld [vmem:[#allocation5 + $0x98] sm:$0xff]   ;;  %v1124_v17 = vld [vmem:[#allocation5 + $0x10] sm:$0xff]   ;;  %v1126_v19 = vld [vmem:[#allocation5 + $0x48] sm:$0xff]  }
  0x50   :  { %v1125_v18 = vld [vmem:[#allocation5 + $0x90] sm:$0xff]   ;;  %v1127_v21 = vld [vmem:[#allocation5 + $0x8] sm:$0xff]   ;;  %v1129_v24 = vld [vmem:[#allocation5 + $0x40] sm:$0xff]  }
  0x51   :  { %937 = vmatpush3.bf16.msra.mxu0 %v1112_v4  ;;  %v121_v20 = vld [vmem:[#allocation2 + $0x8] sm:$0xff]  ;;  %v1128_v22 = vld [vmem:[#allocation5 + $0x88] sm:$0xff]   ;;  %v1130_v25 = vld [vmem:[#allocation5] sm:$0xff]  }
  0x52   :  { %938 = vmatprep.subr.bf16.mxu0 %v1114_v6  ;;  %1003 = vmatpush3.bf16.msra.mxu1 %v1116_v9  ;;  %v124_v23 = vpack.c.bf16 %v121_v20, %v121_v20  ;;  %v1131_v26 = vld [vmem:[#allocation5 + $0x80] sm:$0xff]   ;;  %v120_v27 = vld [vmem:[#allocation2] sm:$0xff]  ;;  %v122_v28 = vld [vmem:[#allocation2 + $0x10] sm:$0xff] }
  0x53   :  { %1004 = vmatprep.subr.bf16.mxu1 %v1322_v0  ;;  %v1132_v29 = vld [vmem:[#allocation7 + $0x38] sm:$0xff]   ;;  %v123_v30 = vpack.c.bf16 %v120_v27, %v120_v27  ;;  %v125_v31 = vpack.c.bf16 %v122_v28, %v122_v28  ;;  %v1133_v32 = vld [vmem:[#allocation7 + $0x30] sm:$0xff]   ;;  %v1134_v33 = vld [vmem:[#allocation7 + $0x28] sm:$0xff]  }
  0x54   :  { %353 = vmatprep.mubr.bf16.mxu0 %v124_v23  ;;  %v1135_v34 = vld [vmem:[#allocation7 + $0x20] sm:$0xff]   ;;  %v1136_v35 = vld [vmem:[#allocation7 + $0x18] sm:$0xff]   ;;  %v1137_v36 = vld [vmem:[#allocation7 + $0x10] sm:$0xff]  }
  0x55   :  { %939 = vmatpush3.bf16.msra.mxu0 %v1115_v8  ;;  %v1138_v37 = vld [vmem:[#allocation7 + $0x8] sm:$0xff]   ;;  %v1139_v38 = vld [vmem:[#allocation7] sm:$0xff]   ;;  %v1140_v39 = vld [vmem:[#allocation8 + $0x38] sm:$0xff]  }
  0x56   :  { %940 = vmatprep.subr.bf16.mxu0 %v1117_v10  ;;  %1005 = vmatpush3.bf16.msra.mxu1 %v1119_v12  ;;  %v1141_v40 = vld [vmem:[#allocation8 + $0x30] sm:$0xff]   ;;  %v1142_v41 = vld [vmem:[#allocation8 + $0x28] sm:$0xff]   ;;  %v1143_v42 = vld [vmem:[#allocation8 + $0x20] sm:$0xff]  }
  0x57   :  { %1006 = vmatprep.subr.bf16.mxu1 %v1322_v0  ;;  %v1144_v43 = vld [vmem:[#allocation8 + $0x18] sm:$0xff]   ;;  %v1145_v44 = vld [vmem:[#allocation8 + $0x10] sm:$0xff]   ;;  %v1146_v59 = vld [vmem:[#allocation8 + $0x8] sm:$0xff]  }
  0x58   :  { %v873_v47 = vld [vmem:[%s1487_s2] ss:$0 sm:$0xff]  ;;  %v1147_v60 = vld [vmem:[#allocation8] sm:$0xff]   ;;  %v1148_v61 = vld [vmem:[#allocation10 + $0x38] sm:$0xff]  }
  0x59   :  { %941 = vmatpush3.bf16.msra.mxu0 %v1118_v11  ;;  %v1149_v62 = vld [vmem:[#allocation10 + $0x30] sm:$0xff]   ;;  %v1150_v63 = vld [vmem:[#allocation10 + $0x28] sm:$0xff]   ;;  %v1151_v1 = vld [vmem:[#allocation10 + $0x20] sm:$0xff]  }
  0x5a   :  { %942 = vmatprep.subr.bf16.mxu0 %v1120_v13  ;;  %1007 = vmatpush3.bf16.msra.mxu1 %v1122_v15  ;;  %v1152_v2 = vld [vmem:[#allocation10 + $0x18] sm:$0xff]   ;;  %v1153_v3 = vld [vmem:[#allocation10 + $0x10] sm:$0xff]   ;;  %v1154_v12 = vld [vmem:[#allocation10 + $0x8] sm:$0xff]  }
  0x5b   :  { %1008 = vmatprep.subr.bf16.mxu1 %v1322_v0  ;;  %v898_v4 = vld [vmem:[%s1489_s4] ss:$0 sm:$0xff]  ;;  %v1155_v13 = vld [vmem:[#allocation10] sm:$0xff]   ;;  %v1162_v28 = vld [vmem:[#allocation11 + $0x8] sm:$0xff]  }
  0x5c   :  { %v1157_v15 = vld [vmem:[#allocation11 + $0x30] sm:$0xff]  }
  0x5d   :  { %943 = vmatpush3.bf16.msra.mxu0 %v1121_v14  ;;  %v1156_v14 = vld [vmem:[#allocation11 + $0x38] sm:$0xff]   ;;  %v907_v20 = vld [vmem:[%s1491_s6] ss:$0 sm:$0xff] }
  0x5e   :  { %944 = vmatprep.subr.bf16.mxu0 %v1123_v16  ;;  %1009 = vmatpush3.bf16.msra.mxu1 %v1125_v18  ;;  %v1158_v16 = vld [vmem:[#allocation11 + $0x28] sm:$0xff]   ;;  %v1160_v18 = vld [vmem:[#allocation11 + $0x18] sm:$0xff]  }
  0x5f   :  { %1010 = vmatprep.subr.bf16.mxu1 %v1322_v0 }
  0x61   :  { %945 = vmatpush3.bf16.msra.mxu0 %v1124_v17  ;;  %v1159_v17 = vld [vmem:[#allocation11 + $0x20] sm:$0xff]  }
  0x62   :  { %946 = vmatprep.subr.bf16.mxu0 %v1126_v19  ;;  %1011 = vmatpush3.bf16.msra.mxu1 %v1128_v22  ;;  %v1161_v19 = vld [vmem:[#allocation11 + $0x10] sm:$0xff]  }
  0x63   :  { %1012 = vmatprep.subr.bf16.mxu1 %v1322_v0 }
  0x65   :  { %947 = vmatpush3.bf16.msra.mxu0 %v1127_v21 }
  0x66   :  { %948 = vmatprep.subr.bf16.mxu0 %v1129_v24  ;;  %1013 = vmatpush3.bf16.msra.mxu1 %v1131_v26 }
  0x67   :  { %1018 = vmatprep.subr.bf16.mxu1 %v1322_v0 }
  0x69   :  { %949 = vmatpush3.bf16.msra.mxu0 %v1130_v25  ;;  %1015 = vmatmul.mubr.msk.bf16.vlgmr.msra.gmra.mxu1 %vm313_vm2, %v125_v31 }
  0x6a   :  { %1038 = vmatprep.subr.bf16.mxu0 %v1322_v0  ;;  %1019 = vmatpush3.bf16.msra.mxu1 %v1132_v29  ;;  %v1163_v29 = vld [vmem:[#allocation11] sm:$0xff]  }
  0x6b   :  { %1034 = vmatprep.mubr.msk.bf16.mxu1 %vm1323_vm0, %v1322_v0  ;;  %1020 = vmatprep.subr.bf16.mxu1 %v1322_v0 }
  0x6c   :  { %354 = vmatmul.mubr.bf16.vlgmr.msra.gmra.mxu0 %v123_v30  ;;  %v916_v30 = vld [vmem:[%s1493_s8] ss:$0 sm:$0xff]  ;;  %s1284_s8 = scalar_lea.vmem %s862_s12, 64 }
  0x6d   :  { %1054 = vmatprep.mubr.msk.bf16.mxu0 %vm1323_vm0, %v1322_v0  ;;  %1039 = vmatpush3.bf16.msra.mxu0 %v1140_v39  ;;  %p1285_p2 = scmp.ne.s32.totalorder %s862_s12, %s1284_s8  ;;  %p1290_p4 = scmp.lt.s32.totalorder %s1284_s8, %s1284_s8 }
  0x6e   :  { %1021 = vmatpush3.bf16.msra.mxu1 %v1133_v32  ;;  %1040 = vmatprep.subr.bf16.mxu0 %v1322_v0 }
  0x6f   :  { %1022 = vmatprep.subr.bf16.mxu1 %v1322_v0  ;;  %p1291_p5 = por %p1290_p4, %p1289_p3 }
  0x71   :  { %1041 = vmatpush3.bf16.msra.mxu0 %v1141_v40  ;;  %p1292_p6 = pnand %p1291_p5, %p1285_p2 }
  0x72   :  { %1023 = vmatpush3.bf16.msra.mxu1 %v1134_v33  ;;  %1042 = vmatprep.subr.bf16.mxu0 %v1322_v0 }
  0x73   :  { %1024 = vmatprep.subr.bf16.mxu1 %v1322_v0 }
  0x75   :  { %1043 = vmatpush3.bf16.msra.mxu0 %v1142_v41 }
  0x76   :  { %1025 = vmatpush3.bf16.msra.mxu1 %v1135_v34  ;;  %1044 = vmatprep.subr.bf16.mxu0 %v1322_v0 }
  0x77   :  { %1026 = vmatprep.subr.bf16.mxu1 %v1322_v0 }
  0x79   :  { %1045 = vmatpush3.bf16.msra.mxu0 %v1143_v42 }
  0x7a   :  { %1027 = vmatpush3.bf16.msra.mxu1 %v1136_v35  ;;  %1046 = vmatprep.subr.bf16.mxu0 %v1322_v0 }
  0x7b   :  { %1028 = vmatprep.subr.bf16.mxu1 %v1322_v0 }
  0x7d   :  { %1047 = vmatpush3.bf16.msra.mxu0 %v1144_v43 }
  0x7e   :  { %1029 = vmatpush3.bf16.msra.mxu1 %v1137_v36  ;;  %1048 = vmatprep.subr.bf16.mxu0 %v1322_v0 }
  0x7f   :  { %1030 = vmatprep.subr.bf16.mxu1 %v1322_v0 }
  0x81   :  { %1049 = vmatpush3.bf16.msra.mxu0 %v1145_v44 }
  0x82   :  { %1031 = vmatpush3.bf16.msra.mxu1 %v1138_v37  ;;  %1050 = vmatprep.subr.bf16.mxu0 %v1322_v0 }
  0x83   :  { %1032 = vmatprep.subr.bf16.mxu1 %v1322_v0 }
  0x85   :  { %1051 = vmatpush3.bf16.msra.mxu0 %v1146_v59 }
  0x86   :  { %1033 = vmatpush3.bf16.msra.mxu1 %v1139_v38  ;;  %1052 = vmatprep.subr.bf16.mxu0 %v1322_v0  ;;  %v925_v38 = vld [vmem:[%s1495_s10] ss:$0 sm:$0xff] }
  0x87   :  { %1058 = vmatprep.subr.bf16.mxu1 %v1322_v0 }
  0x89   :  { %1053 = vmatpush3.bf16.msra.mxu0 %v1147_v60 }
  0x8a   :  { %1078 = vmatprep.subr.bf16.mxu0 %v1322_v0 }
 0x129   :  { %v395_v46 = vpop.f32.mrf.mxu1 }
 0x12b   :  { %v1016_v49 = vpop.f32.mrf.mxu1 }
 0x12c   :  { %v950_v45 = vpop.f32.mrf.mxu0 }
 0x12d   :  { %v398_v52 = vpop.f32.mrf.mxu1 }
 0x12e   :  { %v951_v48 = vpop.f32.mrf.mxu0 }
 0x12f   :  { %v952_v50 = vadd.f32 %v951_v48, %v950_v45  ;;  %v1017_v55 = vpop.f32.mrf.mxu1 }
 0x130   :  { %v953_v51 = vpop.f32.mrf.mxu0 }
 0x131   :  { %v356_v53 = vadd.f32 %v952_v50, %v873_v47 }
 0x132   :  { %v954_v54 = vpop.f32.mrf.mxu0 }
 0x133   :  { %v396_v56 = vadd.f32 %v395_v46, %v356_v53 }
 0x135   :  { %v401_v57 = vmax.f32 %v396_v56, 0.0 }
 0x137   :  { %v402_v58 = vpack.c.bf16 %v401_v57, %v401_v57 }
 0x139   :  { %1035 = vmatmul.mubr.bf16.vlgmr.msra.gmra.mxu1 %v402_v58 }
 0x13a   :  { %1074 = vmatprep.mubr.msk.bf16.mxu1 %vm1323_vm0, %v1322_v0  ;;  %1059 = vmatpush3.bf16.msra.mxu1 %v1148_v61 }
 0x13b   :  { %1060 = vmatprep.subr.bf16.mxu1 %v1322_v0 }
 0x13e   :  { %1061 = vmatpush3.bf16.msra.mxu1 %v1149_v62 }
 0x13f   :  { %1062 = vmatprep.subr.bf16.mxu1 %v1322_v0 }
 0x142   :  { %1063 = vmatpush3.bf16.msra.mxu1 %v1150_v63 }
 0x143   :  { %1064 = vmatprep.subr.bf16.mxu1 %v1322_v0 }
 0x146   :  { %1065 = vmatpush3.bf16.msra.mxu1 %v1151_v1 }
 0x147   :  { %1066 = vmatprep.subr.bf16.mxu1 %v1322_v0 }
 0x14a   :  { %1067 = vmatpush3.bf16.msra.mxu1 %v1152_v2 }
 0x14b   :  { %1068 = vmatprep.subr.bf16.mxu1 %v1322_v0 }
 0x14e   :  { %1069 = vmatpush3.bf16.msra.mxu1 %v1153_v3 }
 0x14f   :  { %1070 = vmatprep.subr.bf16.mxu1 %v1322_v0 }
 0x152   :  { %1071 = vmatpush3.bf16.msra.mxu1 %v1154_v12 }
 0x153   :  { %1072 = vmatprep.subr.bf16.mxu1 %v1322_v0 }
 0x156   :  { %1073 = vmatpush3.bf16.msra.mxu1 %v1155_v13 }
 0x1f9   :  { %v508_v5 = vpop.f32.mrf.mxu1 }
 0x1fa   :  { %v509_v6 = vadd.f32 %v898_v4, %v508_v5 }
 0x1fb   :  { %v1036_v7 = vpop.f32.mrf.mxu1 }
 0x1fc   :  { %v514_v8 = vmax.f32 %v509_v6, 0.0 }
 0x1fd   :  { %v511_v9 = vpop.f32.mrf.mxu1 }
 0x1fe   :  { %v515_v10 = vpack.c.bf16 %v514_v8, %v514_v8 }
 0x1ff   :  { %v1037_v11 = vpop.f32.mrf.mxu1 }
 0x200   :  { %1055 = vmatmul.mubr.bf16.vlgmr.msra.gmra.mxu0 %v515_v10 }
 0x201   :  { %1094 = vmatprep.mubr.msk.bf16.mxu0 %vm1323_vm0, %v1322_v0  ;;  %1079 = vmatpush3.bf16.msra.mxu0 %v1156_v14 }
 0x202   :  { %1080 = vmatprep.subr.bf16.mxu0 %v1322_v0 }
 0x205   :  { %1081 = vmatpush3.bf16.msra.mxu0 %v1157_v15 }
 0x206   :  { %1082 = vmatprep.subr.bf16.mxu0 %v1322_v0 }
 0x209   :  { %1083 = vmatpush3.bf16.msra.mxu0 %v1158_v16 }
 0x20a   :  { %1084 = vmatprep.subr.bf16.mxu0 %v1322_v0 }
 0x20d   :  { %1085 = vmatpush3.bf16.msra.mxu0 %v1159_v17 }
 0x20e   :  { %1086 = vmatprep.subr.bf16.mxu0 %v1322_v0 }
 0x211   :  { %1087 = vmatpush3.bf16.msra.mxu0 %v1160_v18 }
 0x212   :  { %1088 = vmatprep.subr.bf16.mxu0 %v1322_v0 }
 0x215   :  { %1089 = vmatpush3.bf16.msra.mxu0 %v1161_v19 }
 0x216   :  { %1090 = vmatprep.subr.bf16.mxu0 %v1322_v0 }
 0x219   :  { %1091 = vmatpush3.bf16.msra.mxu0 %v1162_v28 }
 0x21a   :  { %1092 = vmatprep.subr.bf16.mxu0 %v1322_v0 }
 0x21d   :  { %1093 = vmatpush3.bf16.msra.mxu0 %v1163_v29 }
 0x2c0   :  { %v621_v21 = vpop.f32.mrf.mxu0 }
 0x2c1   :  { %v622_v22 = vadd.f32 %v907_v20, %v621_v21 }
 0x2c2   :  { %v1056_v23 = vpop.f32.mrf.mxu0 }
 0x2c3   :  { %v627_v24 = vmax.f32 %v622_v22, 0.0 }
 0x2c4   :  { %v624_v25 = vpop.f32.mrf.mxu0 }
 0x2c5   :  { %v628_v26 = vpack.c.bf16 %v627_v24, %v627_v24 }
 0x2c6   :  { %v1057_v27 = vpop.f32.mrf.mxu0 }
 0x2c7   :  { %1075 = vmatmul.mubr.bf16.vlgmr.msra.gmra.mxu1 %v628_v26 }
 0x387   :  { %v734_v31 = vpop.f32.mrf.mxu1 }
 0x388   :  { %v735_v32 = vadd.f32 %v916_v30, %v734_v31 }
 0x389   :  { %v1076_v33 = vpop.f32.mrf.mxu1 }
 0x38a   :  { %v740_v34 = vmax.f32 %v735_v32, 0.0 }
 0x38b   :  { %v737_v35 = vpop.f32.mrf.mxu1 }
 0x38c   :  { %v741_v36 = vpack.c.bf16 %v740_v34, %v740_v34 }
 0x38d   :  { %v1077_v37 = vpop.f32.mrf.mxu1 }
 0x38e   :  { %1095 = vmatmul.mubr.bf16.vlgmr.msra.gmra.mxu0 %v741_v36 }
 0x44e   :  { %v847_v39 = vpop.f32.mrf.mxu0 }
 0x44f   :  { %v848_v0 = vadd.f32 %v925_v38, %v847_v39 }
 0x450   :  { %v1096_v40 = vpop.f32.mrf.mxu0 }
 0x451   :  { %v853_v41 = vpack.c.bf16 %v848_v0, %v848_v0 }
 0x452   :  { %v850_v42 = vpop.f32.mrf.mxu0 }
 0x453   :  { %854 = vst [vmem:[#allocation13] sm:$0xf] %v853_v41 }
 0x454   :  { %v1097_v43 = vpop.f32.mrf.mxu0 }
 0x455   :  { %1295 = shalt.err (!%p1292_p6)
}
 0x456   :  { %864 = dma.vmem_to_hbm [thread:$0]  %s862_s12, 64, %s1496_s11, [#allocation4]  }
 0x457   :  { %1312 = dma.done.wait [#allocation4], 64  }
 0x458   :  { %1313 = vsyncadd [#allocation4], 4294967232 }
 0x459   :  { %868 = vsyncpa [#allocation3], 1 }
 0x45a   :  { %869 = vsyncpa [#allocation6], 1 }
 0x45b   :  { %870 = vsyncpa [#allocation9], 1 }
 0x45c   :  { %871 = vsyncpa [#allocation12], 1 }
 0x45d   :  { %872 = vsyncpa [#allocation4], 1 }

</bundles_post_ra>
